<compile_context>
chip_gen: v6e
topology: v6e:2x2x1
jax: 0.10.0
libtpu: 0.0.40
codegen_flags: <defaults>
</compile_context>

<pallas_src>
import jax
import jax.numpy as jnp
from jax.experimental import pallas as pl
from jax.experimental.pallas import tpu as pltpu


# ---------------------------------------------------------------------------
# generation-aware tiling knobs
# ---------------------------------------------------------------------------
def _device_kind():
    try:
        return jax.devices()[0].device_kind.lower()
    except Exception:
        return ""


_IS_V7 = "v7" in _device_kind()
# v5e / v6e: one TensorCore per chip -> splitting the "parallel" batch axis buys
# nothing; take the biggest block that fits (amortizes the ~0.35 us/step cost).
# v7x: 2 TensorCores -> keep >= 2 parallel grid blocks, but a tighter per-block
# budget (64 MiB physical VMEM vs 128 MiB on v5e/v6e).
_PREFER_SPLIT = _IS_V7
_TARGET_BLOCK_BYTES = (4 << 20) if _IS_V7 else (12 << 20)


def _pick_tile(n, row_bytes, target_bytes=None, prefer_split=None):
    """Largest row-tile that divides n, is a multiple of 8 (or equals n), and
    keeps one block (including budgeted in-kernel temporaries) under
    target_bytes. On v7x prefers >= 2 grid steps so the 'parallel' batch axis
    can shard across the two TensorCores."""
    if target_bytes is None:
        target_bytes = _TARGET_BLOCK_BYTES
    if prefer_split is None:
        prefer_split = _PREFER_SPLIT
    cands = [t for t in range(1, n + 1) if n % t == 0 and (t % 8 == 0 or t == n)]

    def fits(t):
        return t * row_bytes <= target_bytes

    if prefer_split:
        split = [t for t in cands if t < n and fits(t)]
        if split:
            return max(split)
    fitting = [t for t in cands if fits(t)]
    return max(fitting) if fitting else min(cands)


def _vmem_limit(stream_bytes, temp_bytes=0):
    """Double-buffered BlockSpec streams + in-kernel temporaries + headroom,
    clipped so the request is valid on every generation (v7x: 64 MiB/TC)."""
    need = 2 * stream_bytes + temp_bytes + (4 << 20)
    return int(min(max(need, 16 << 20), 64 << 20))


# ---------------------------------------------------------------------------
# kernel 1: the two micro-linears (intent_d, inputSlot) in one pallas_call
# ---------------------------------------------------------------------------
def _dual_linear_tanh_kernel(x_ref, w_ref, b_ref, o_ref):
    # x: (bt, Din)  w: (Din, Dout)  b: (1, Dout)  o: (bt, Dout)
    # (the stacked weight-select axis is squeezed out by the BlockSpec)
    y = jnp.dot(x_ref[...], w_ref[...], preferred_element_type=jnp.float32)
    o_ref[...] = jnp.tanh(y + b_ref[...]).astype(o_ref.dtype)


def dual_linear_tanh(x_stack, w_stack, b_stack):
    """tanh(x_stack[s] @ w_stack[s] + b_stack[s]) for s in {0, 1} as ONE call.

    x_stack: (S, N, Din), w_stack: (S, Din, Dout), b_stack: (S, 1, Dout).
    Returns (S, N, Dout) float32.
    """
    S, N, din = x_stack.shape
    dout = w_stack.shape[-1]
    row_bytes = 4 * (din + dout)
    bt = _pick_tile(N, row_bytes)
    stream_bytes = bt * (din + dout) * 4 + (din * dout + dout) * 4

    return pl.pallas_call(
        _dual_linear_tanh_kernel,
        out_shape=jax.ShapeDtypeStruct((S, N, dout), jnp.float32),
        grid_spec=pltpu.PrefetchScalarGridSpec(
            num_scalar_prefetch=0,
            grid=(S, N // bt),
            in_specs=[
                pl.BlockSpec((None, bt, din), lambda s, i: (s, i, 0)),
                pl.BlockSpec((None, din, dout), lambda s, i: (s, 0, 0)),
                pl.BlockSpec((None, 1, dout), lambda s, i: (s, 0, 0)),
            ],
            out_specs=pl.BlockSpec((None, bt, dout), lambda s, i: (s, i, 0)),
        ),
        compiler_params=pltpu.CompilerParams(
            dimension_semantics=("parallel", "parallel"),
            vmem_limit_bytes=_vmem_limit(stream_bytes)),
        cost_estimate=pl.CostEstimate(
            flops=2 * S * N * din * dout,
            transcendentals=S * N * dout,
            bytes_accessed=4 * (S * N * din + S * din * dout + S * dout
                                + S * N * dout)),
    )(x_stack, w_stack, b_stack)


# ---------------------------------------------------------------------------
# kernel 2: weightS_out linear FUSED with masked attention pooling over L
# ---------------------------------------------------------------------------
def _fused_outputs_attn_kernel(len_ref, q_ref, enc_ref, w_ref, b_ref,
                               outh_ref, ctx_ref):
    # len_ref : (bt, 1) int32   valid lengths (mask[b, l] = l >= len[b])
    # q_ref   : (bt, D) f32     slot query = tanh(weightS_in(inputSlot))
    # enc_ref : (bt, L, D) f32  RAW encoder outputs
    # w_ref   : (D, D), b_ref: (1, D)   weightS_out parameters
    # outh_ref: (bt, L, D)      outputs_h = tanh(enc @ w + b)   (fused output)
    # ctx_ref : (bt, D)         attention context (lane-dense block)
    bt, L, D = enc_ref.shape

    # outputs_h on the MXU, on the block already resident for the attention.
    enc2 = enc_ref[...].reshape(bt * L, D)        # collapse leading dims only
    h2 = jnp.tanh(
        jnp.dot(enc2, w_ref[...], preferred_element_type=jnp.float32)
        + b_ref[...])
    enc_h = h2.reshape(bt, L, D)
    outh_ref[...] = enc_h.astype(outh_ref.dtype)

    # scores[b, l] = sum_d q[b, d] * enc_h[b, l, d]   (VPU mul + lane reduce)
    q = q_ref[...]
    scores = jnp.sum(q[:, None, :] * enc_h, axis=-1)             # (bt, L)

    # padding mask built in-kernel (no (B, L) mask HBM stream)
    pos = jax.lax.broadcasted_iota(jnp.int32, scores.shape, 1)
    scores = jnp.where(pos >= len_ref[...], jnp.float32(-1.0e12), scores)

    # numerically stable softmax over L with DEFERRED normalization:
    # ctx = (sum_l exp(scores - max) * enc_h) * 1/denom
    smax = jnp.max(scores, axis=-1, keepdims=True)
    p = jnp.exp(scores - smax)                                   # (bt, L)
    denom = jnp.sum(p, axis=-1, keepdims=True)                   # (bt, 1)
    ctx = jnp.sum(p[:, :, None] * enc_h, axis=1)                 # (bt, D)
    # approx reciprocal -> EUP slot; deliberate ~1e-4-level deviation from an
    # exact softmax normalization (use approx=False for strict parity tests).
    ctx_ref[...] = (ctx * pl.reciprocal(denom, approx=True)).astype(ctx_ref.dtype)
    # TODO(synk): for very large bt*L*D, chunk L with an online-softmax
    # fori_loop to bound the (bt, L, D) live ranges (spill avoidance).


def fused_outputs_attn(slot_q, outputs, w_out, b_out, lengths):
    """outputs_h = tanh(outputs @ w_out + b_out); slot_d = masked-softmax
    attention pooling of outputs_h with query slot_q.

    slot_q: (B, D) or (B, 1, D); outputs: (B, L, D); lengths: (B,) int32
    (mask[b, l] = l >= lengths[b], matching masked_fill(mask, -1e12)+softmax).
    A fully-masked row yields a uniform alpha (mean of outputs_h), exactly as
    the PyTorch -1e12 fill does. Returns (outputs_h (B, L, D), slot_d (B, D)).
    """
    B, L, D = outputs.shape
    q = slot_q.reshape(B, D).astype(jnp.float32)
    enc = outputs.astype(jnp.float32)
    lens = lengths.astype(jnp.int32).reshape(B, 1)
    w = w_out.astype(jnp.float32)
    b = b_out.reshape(1, D).astype(jnp.float32)

    # per-row budget: enc in + outputs_h out + ~2 (bt,L,D) in-kernel temps + q/ctx
    row_bytes = 4 * (4 * L * D + 2 * D)
    bt = _pick_tile(B, row_bytes)
    stream_bytes = bt * (2 * L * D + 2 * D) * 4 + (D * D + D + bt) * 4
    temp_bytes = bt * 2 * L * D * 4

    outputs_h, ctx = pl.pallas_call(
        _fused_outputs_attn_kernel,
        out_shape=(jax.ShapeDtypeStruct((B, L, D), jnp.float32),
                   jax.ShapeDtypeStruct((B, D), jnp.float32)),
        grid_spec=pltpu.PrefetchScalarGridSpec(
            num_scalar_prefetch=0,
            grid=(B // bt,),
            in_specs=[
                pl.BlockSpec((bt, 1), lambda i: (i, 0)),         # lengths
                pl.BlockSpec((bt, D), lambda i: (i, 0)),         # slot query
                pl.BlockSpec((bt, L, D), lambda i: (i, 0, 0)),   # raw outputs
                pl.BlockSpec((D, D), lambda i: (0, 0)),          # wS_out (const)
                pl.BlockSpec((1, D), lambda i: (0, 0)),          # bS_out (const)
            ],
            out_specs=[
                pl.BlockSpec((bt, L, D), lambda i: (i, 0, 0)),   # outputs_h
                pl.BlockSpec((bt, D), lambda i: (i, 0)),         # slot_d
            ],
        ),
        compiler_params=pltpu.CompilerParams(
            dimension_semantics=("parallel",),
            vmem_limit_bytes=_vmem_limit(stream_bytes, temp_bytes)),
        cost_estimate=pl.CostEstimate(
            flops=2 * B * L * D * D + 4 * B * L * D,
            transcendentals=B * L * D + B * L,
            bytes_accessed=4 * (2 * B * L * D + 2 * B * D + D * D + D) + 4 * B),
    )(lens, q, enc, w, b)
    return outputs_h, ctx


# ---------------------------------------------------------------------------
# Seq2Slots forward
# ---------------------------------------------------------------------------
def init_seq2slots_params(key, hidden_size):
    # NOTE: weights are stored (in_features, out_features) and used as x @ w.
    # PyTorch nn.Linear stores (out, in) and computes x @ W.T, so transpose
    # real checkpoint weights when loading.
    ks = jax.random.split(key, 6)
    scale = 1.0 / jnp.sqrt(hidden_size).astype(jnp.float32)

    def lin(kw, kb):
        w = jax.random.normal(kw, (hidden_size, hidden_size), jnp.float32) * scale
        b = jax.random.normal(kb, (hidden_size,), jnp.float32) * 0.1
        return w, b

    wI, bI = lin(ks[0], ks[1])
    wSin, bSin = lin(ks[2], ks[3])
    wSout, bSout = lin(ks[4], ks[5])
    return dict(wI_in=wI, bI_in=bI, wS_in=wSin, bS_in=bSin,
                wS_out=wSout, bS_out=bSout)


def seq2slots_forward(params, input_slot, outputs, intent_d, lengths):
    """Pallas forward of Seq2Slots.

    input_slot: (B, 1, D), outputs: (B, L, D), intent_d: (B, 1, D),
    lengths: (B,) int32 (padding mask is l >= lengths[b]).
    Returns (slot_d (B, D), intent_h (B, 1, D), outputs_h (B, L, D)).
    """
    B, L, D = outputs.shape

    # --- weightI_in / weightS_in micro-linears merged into one pallas_call ---
    x_stack = jnp.stack([intent_d.reshape(B, D).astype(jnp.float32),
                         input_slot.reshape(B, D).astype(jnp.float32)], axis=0)
    w_stack = jnp.stack([params["wI_in"], params["wS_in"]], axis=0).astype(jnp.float32)
    b_stack = jnp.stack([params["bI_in"].reshape(1, D),
                         params["bS_in"].reshape(1, D)], axis=0).astype(jnp.float32)
    y = dual_linear_tanh(x_stack, w_stack, b_stack)              # (2, B, D)
    intent_h = y[0].reshape(B, 1, D)
    slot_q = y[1]                                                # (B, D)

    # --- weightS_out linear fused with the masked attention pooling ----------
    outputs_h, slot_d = fused_outputs_attn(
        slot_q, outputs, params["wS_out"], params["bS_out"], lengths)

    # TODO(synk): `self.decoder` (dec_slot) is an injected submodule whose
    # forward is not defined in this spec, so it is not implemented here.
    return slot_d, intent_h, outputs_h


# ---------------------------------------------------------------------------
# pure-JAX reference
# ---------------------------------------------------------------------------
def _reference(params, input_slot, outputs, intent_d, lengths):
    hp = jax.lax.Precision.HIGHEST

    def lt(x, w, b):
        return jnp.tanh(jnp.dot(x, w, precision=hp) + b)

    intent_h = lt(intent_d, params["wI_in"], params["bI_in"])
    slot_q = lt(input_slot, params["wS_in"], params["bS_in"])
    outputs_h = lt(outputs, params["wS_out"], params["bS_out"])

    B, L, D = outputs_h.shape
    mask = jnp.arange(L)[None, :] >= lengths[:, None]
    scores = jnp.einsum("bd,bld->bl", slot_q[:, 0, :], outputs_h, precision=hp)
    scores = jnp.where(mask, -1.0e12, scores)
    alpha = jax.nn.softmax(scores, axis=-1)
    slot_d = jnp.einsum("bl,bld->bd", alpha, outputs_h, precision=hp)
    return slot_d, intent_h, outputs_h


if __name__ == "__main__":
    B, L, D = 16, 8, 32   # batch, seq len, hidden_size
    key = jax.random.PRNGKey(0)
    kp, k1, k2, k3 = jax.random.split(key, 4)

    params = init_seq2slots_params(kp, D)
    input_slot = jax.random.normal(k1, (B, 1, D), dtype=jnp.float32)
    intent_d = jax.random.normal(k2, (B, 1, D), dtype=jnp.float32)
    outputs = jax.random.normal(k3, (B, L, D), dtype=jnp.float32)
    lengths = (jnp.arange(B, dtype=jnp.int32) % L) + 1        # deterministic 1..L

    slot_d, intent_h, outputs_h = seq2slots_forward(
        params, input_slot, outputs, intent_d, lengths)
    slot_d = jax.block_until_ready(slot_d)

    ref_slot_d, ref_intent_h, ref_outputs_h = _reference(
        params, input_slot, outputs, intent_d, lengths)

    assert slot_d.shape == (B, D)
    assert intent_h.shape == (B, 1, D)
    assert outputs_h.shape == (B, L, D)
    assert jnp.allclose(intent_h, ref_intent_h, atol=1e-3, rtol=1e-3), "intent mismatch"
    assert jnp.allclose(outputs_h, ref_outputs_h, atol=1e-3, rtol=1e-3), "outputs mismatch"
    assert jnp.allclose(slot_d, ref_slot_d, atol=5e-3, rtol=5e-3), "slot_d mismatch"

    print("KERNEL_OK")
</pallas_src>

<mosaic_0001>
module attributes {stable_mosaic.version = 11 : i64} {
  func.func @_dual_linear_tanh_kernel(%arg0: i32, %arg1: i32, %arg2: memref<1x16x32xf32, #tpu.memory_space<vmem>>, %arg3: memref<1x32x32xf32, #tpu.memory_space<vmem>>, %arg4: memref<1x1x32xf32, #tpu.memory_space<vmem>>, %arg5: memref<1x16x32xf32, #tpu.memory_space<vmem>>) attributes {dimension_semantics = [#tpu.dimension_semantics<parallel>, #tpu.dimension_semantics<parallel>], iteration_bounds = array<i64: 2, 1>, scalar_prefetch = 0 : i64, scratch_operands = 0 : i64, tpu.core_type = #tpu.core_type<tc>, window_params = [{transform_indices = @transform_0, window_bounds = array<i64: 1, 16, 32>}, {transform_indices = @transform_1, window_bounds = array<i64: 1, 32, 32>}, {transform_indices = @transform_2, window_bounds = array<i64: 1, 1, 32>}, {transform_indices = @transform_3, window_bounds = array<i64: 1, 16, 32>}]} {
    %c0 = arith.constant 0 : index
    %c0_0 = arith.constant 0 : index
    %c0_1 = arith.constant 0 : index
    %0 = vector.load %arg2[%c0, %c0_0, %c0_1] : memref<1x16x32xf32, #tpu.memory_space<vmem>>, vector<1x16x32xf32>
    %1 = vector.shape_cast %0 : vector<1x16x32xf32> to vector<16x32xf32>
    %c0_2 = arith.constant 0 : index
    %c0_3 = arith.constant 0 : index
    %c0_4 = arith.constant 0 : index
    %2 = vector.load %arg3[%c0_2, %c0_3, %c0_4] : memref<1x32x32xf32, #tpu.memory_space<vmem>>, vector<1x32x32xf32>
    %3 = vector.shape_cast %2 : vector<1x32x32xf32> to vector<32x32xf32>
    %cst = arith.constant dense<0.000000e+00> : vector<16x32xf32>
    %4 = tpu.matmul %1, %3, %cst {dimension_numbers = #tpu.dot_dimension_numbers<[1], [0], [0], [1], [0, 0, 1, 1], [], []>} : vector<16x32xf32>, vector<32x32xf32>, vector<16x32xf32> -> vector<16x32xf32>
    %c0_5 = arith.constant 0 : index
    %c0_6 = arith.constant 0 : index
    %c0_7 = arith.constant 0 : index
    %5 = vector.load %arg4[%c0_5, %c0_6, %c0_7] : memref<1x1x32xf32, #tpu.memory_space<vmem>>, vector<1x1x32xf32>
    %6 = vector.shape_cast %5 : vector<1x1x32xf32> to vector<1x32xf32>
    %7 = vector.broadcast %6 : vector<1x32xf32> to vector<16x32xf32>
    %8 = arith.addf %4, %7 : vector<16x32xf32>
    %9 = math.tanh %8 : vector<16x32xf32>
    %c0_8 = arith.constant 0 : index
    %c0_9 = arith.constant 0 : index
    %c0_10 = arith.constant 0 : index
    %10 = vector.load %arg5[%c0_8, %c0_9, %c0_10] : memref<1x16x32xf32, #tpu.memory_space<vmem>>, vector<1x16x32xf32>
    %11 = vector.shape_cast %10 : vector<1x16x32xf32> to vector<16x32xf32>
    %12 = vector.shape_cast %9 : vector<16x32xf32> to vector<1x16x32xf32>
    tpu.vector_store %arg5[%c0_8, %c0_9, %c0_10], %12 {strides = array<i32>} : memref<1x16x32xf32, #tpu.memory_space<vmem>>, vector<1x16x32xf32>,
    return
  }
  func.func @transform_0(%arg0: i32, %arg1: i32) -> (i32, i32, i32) {
    %c0_i32 = arith.constant 0 : i32
    %c0_i32_0 = arith.constant 0 : i32
    return %arg0, %arg1, %c0_i32 : i32, i32, i32
  }
  func.func @transform_1(%arg0: i32, %arg1: i32) -> (i32, i32, i32) {
    %c0_i32 = arith.constant 0 : i32
    %c0_i32_0 = arith.constant 0 : i32
    %c0_i32_1 = arith.constant 0 : i32
    return %arg0, %c0_i32, %c0_i32_0 : i32, i32, i32
  }
  func.func @transform_2(%arg0: i32, %arg1: i32) -> (i32, i32, i32) {
    %c0_i32 = arith.constant 0 : i32
    %c0_i32_0 = arith.constant 0 : i32
    %c0_i32_1 = arith.constant 0 : i32
    return %arg0, %c0_i32, %c0_i32_0 : i32, i32, i32
  }
  func.func @transform_3(%arg0: i32, %arg1: i32) -> (i32, i32, i32) {
    %c0_i32 = arith.constant 0 : i32
    %c0_i32_0 = arith.constant 0 : i32
    return %arg0, %arg1, %c0_i32 : i32, i32, i32
  }
}

</mosaic_0001>

<bundles_post_ra>
// kernel: tpu_custom_call.1
= control target key start
LH: loop header
LB: loop body
LE: loop exit
PB: predicated region body
PF: predicated region fallthrough
CT: control target
= control target key end

     0   :  { %s972_s0 = inlined_call_operand.hbm [shape: f32[2,16,32], index: 0, kind: input, shape index: {}]   ;;  %s973_s1 = inlined_call_operand.hbm [shape: f32[2,32,32], index: 1, kind: input, shape index: {}]   ;;  %s974_s2 = inlined_call_operand.vmem [shape: f32[2,1,32], index: 2, kind: input, shape index: {}]   ;;  %s975_s3 = inlined_call_operand.hbm [shape: f32[2,16,32], index: 3, kind: output, shape index: {}]  }
   0x1   :  { %976 = sst [smem:[#allocation11_spill]] %s972_s0 }
   0x2   :  { %8 = vsyncpa [#allocation3], 0 }
   0x3   :  { %10 = vsyncpa [#allocation3 + $0x1], 0 }
   0x4   :  { %11 = vsyncpa [#allocation6], 0 }
   0x5   :  { %13 = vsyncpa [#allocation6 + $0x1], 0 }
   0x6   :  { %14 = vsyncpa [#allocation4], 0 }
   0x7   :  { %16 = vsyncpa [#allocation4 + $0x1], 0  ;;  %s783_s12 = smov 0   ;;  %s785_s13 = smov 0  }
   0x8   :  { %s787_s14 = smov 0   ;;  %s789_s15 = smov 0  }
   0x9   :  { %s791_s16 = smov 0   ;;  %s793_s17 = smov 0  }
   0xa LB: > { %s497_s18 = sadd.s32 4294967295, %s754_s17   ;;  %s498_s19 = sadd.s32 4294967294, %s754_s17   ;;  %s754_s17 = sphi %s793_s17, %s22_s17   ;;  %s750_s16 = sphi %s791_s16, %s988_s16   ;;  %s746_s15 = sphi %s789_s15, %s987_s15   ;;  %s742_s14 = sphi %s787_s14, %s986_s14   ;;  %s738_s13 = sphi %s785_s13, %s985_s13   ;;  %s734_s12 = sphi %s783_s12, %s984_s12  }
   0xb   : > { %s34_s20 = sadd.s32 1, %s750_s16  ;;  %s43_s21 = sadd.s32 1, %s742_s14 }
   0xc   : > { %p36_p0 = scmp.ge.s32.totalorder %s34_s20, 2  ;;  %p50_p1 = scmp.ne.s32.totalorder %s742_s14, %s738_s13 }
   0xd   : > { %p51_p2 = scmp.eq.s32.totalorder %s754_s17, 0  ;;  %p56_p3 = scmp.ne.s32.totalorder %s738_s13, %s734_s12 }
   0xe   : > { %s990_s20 = smov (%p36_p0, %s34_s20), 0  ;;  %p57_p5 = scmp.eq.s32.totalorder %s497_s18, 0 }
   0xf   : > { %p824_p4 = por %p51_p2, %p50_p1  ;;  %s38_s23 = ssub.s32 %s750_s16, %s990_s20 }
  0x10   : > { %p134_p6 = scmp.eq.s32.totalorder %s497_s18, 1  ;;  %p41_p7 = scmp.eq.s32.totalorder %s38_s23, 0 }
  0x11   : > { %p830_p8 = por %p57_p5, %p56_p3  ;;  %p140_p10 = scmp.eq.s32.totalorder %s498_s19, 1 }
  0x12   : > { %p834_p9 = por %p134_p6, %p50_p1  ;;  %p500_p12 = scmp.ge.s32.totalorder %s754_s17, 2 }
  0x13   : > { %s839_s26 = scalar_select %p41_p7, %s742_s14, %s43_s21  }
  0x14   : > { %p841_p11 = por %p140_p10, %p56_p3  ;;  %p556_p13 = scmp.lt.s32.totalorder %s754_s17, 2 }
  0x15   : > { %s848_s28 = sand.u32 1, %s742_s14   ;;  %s519_s30 = sshll.u32 %s750_s16, 8 }
  0x16   : > { %s501_s29 = sshll.u32 %s848_s28, 4  ;;  %s981_s0 = sld [smem:[#allocation11_spill]] }
  0x17   : > { %s164_s7 = scalar_lea.vmem [#allocation2], %s501_s29  ;;  %p857_p0 = pnand %p556_p13, %p824_p4 }
  0x18   : > { %s173_s8 = sshll.u32 %s164_s7, 4  ;;  %p507_p1 = scmp.ge.s32.totalorder %s754_s17, 1  ;;  %s174_s8 = int_to_ptr.vmem [resolvable:$true] %s173_s8 }
  0x19   : > { %s161_s10 = scalar_lea.sflag [#allocation3], %s848_s28  ;;  %p616_p2 = pneg %p857_p0 }
  0x1a   : > { %s627_s11 = scalar_lea.vmem %s174_s8, 256  ;;  %s756_s18 = smov [#allocation2]  }
  0x1b   : > { %p628_p3 = scmp.ne.s32.totalorder %s174_s8, %s627_s11  ;;  %s632_s19 = sshll.u32 %s756_s18, 4  ;;  %s633_s19 = int_to_ptr.vmem [resolvable:$false] %s632_s19 }
  0x1c   : > { %s172_s6 = scalar_lea.hbm %s981_s0, %s519_s30  ;;  %s634_s21 = scalar_lea.vmem %s633_s19, 512 }
  0x1d   : > { %p630_p5 = pnand %p628_p3, %p616_p2  ;;  %p635_p4 = scmp.lt.s32.totalorder %s174_s8, %s633_s19 }
  0x1e   : > { %p636_p7 = scmp.lt.s32.totalorder %s634_s21, %s627_s11 }
  0x1f   : > { %p631_p6 = pneg %p630_p5 }
  0x20   : > { %p637_p10 = por %p636_p7, %p635_p4 }
  0x22   : > { %p638_p13 = pnand %p637_p10, %p631_p6 }
  0x24   : > { %641 = shalt.err (!%p638_p13)
}
  0x25   : > { %s757_s22 = smov 128   ;;  %s758_s23 = smov 8  }
  0x26   : > { %548 = dma.hbm_to_vmem [thread:$0]  (!%p857_p0), %s172_s6, 256, %s174_s8, %s161_s10, %s757_s22, %s757_s22, %s758_s23  }
  0x27   : > { %p208_p3 = scmp.lt.s32.totalorder %s754_s17, 3  ;;  %s504_s29 = sshll.u32 %s848_s28, 5 }
  0x28   : > { %s520_s30 = sshll.u32 %s750_s16, 9  ;;  %s187_s18 = scalar_lea.vmem [#allocation5], %s504_s29 }
  0x29   : > { %p875_p5 = pnand %p507_p1, %p208_p3  ;;  %s193_s11 = scalar_lea.hbm %s973_s1, %s520_s30 }
  0x2a   : > { %s194_s19 = sshll.u32 %s187_s18, 4  ;;  %s184_s21 = scalar_lea.sflag [#allocation6], %s848_s28  ;;  %s195_s19 = int_to_ptr.vmem [resolvable:$true] %s194_s19 }
  0x2b   : > { %s655_s0 = scalar_lea.vmem %s195_s19, 512  ;;  %s759_s6 = smov [#allocation5]  }
  0x2c   : > { %p656_p6 = scmp.ne.s32.totalorder %s195_s19, %s655_s0  ;;  %s660_s8 = sshll.u32 %s759_s6, 4  ;;  %s661_s8 = int_to_ptr.vmem [resolvable:$false] %s660_s8 }
  0x2d   : > { %s662_s10 = scalar_lea.vmem %s661_s8, 1024  ;;  %p663_p1 = scmp.lt.s32.totalorder %s195_s19, %s661_s8 }
  0x2e   : > { %p658_p4 = pnand %p656_p6, %p616_p2  ;;  %p664_p10 = scmp.lt.s32.totalorder %s662_s10, %s655_s0 }
  0x30   : > { %p659_p7 = pneg %p658_p4  ;;  %p665_p13 = por %p664_p10, %p663_p1 }
  0x32   : > { %p666_p3 = pnand %p665_p13, %p659_p7 }
  0x34   : > { %669 = shalt.err (!%p666_p3)
}
  0x35   : > { %551 = dma.hbm_to_vmem [thread:$0]  (!%p857_p0), %s193_s11, 512, %s195_s19, %s184_s21, %s757_s22, %s757_s22, %s758_s23  }
  0x36   : > { %212 = sbr.rel (%p875_p5) target bundleno = 297 (0x129), region = 32  ;;  %s891_s28 = sand.u32 (!%p875_p5), 1, %s738_s13  }
  0x37   : > { %s508_s29 = sshll.u32 (!%p875_p5), %s891_s28, 4  ;;  %s215_s30 = scalar_lea.sflag (!%p875_p5), [#allocation3], %s891_s28 }
  0x38   : > { %s218_s0 = scalar_lea.vmem (!%p875_p5), [#allocation2], %s508_s29 }
  0x3b   : > { %721 = dma.done.wait (%p830_p8), %s215_s30, 256  }
  0x3c   : > { %723 = vsyncadd (%p830_p8), %s215_s30, 4294967040  ;;  %s509_s9 = sshll.u32 %s891_s28, 5  ;;  %s224_s22 = scalar_lea.sflag [#allocation6], %s891_s28 }
  0x3d   : > { %s227_s23 = scalar_lea.vmem [#allocation5], %s509_s9 }
  0x3e   : > { %725 = dma.done.wait (%p830_p8), %s224_s22, 512  }
  0x3f   : > { %727 = vsyncadd (%p830_p8), %s224_s22, 4294966784  ;;  %vm276_vm0 = vcmask 261120   ;;  %v268_v0 = vld [vmem:[%s227_s23 + $0x18] sm:$0xff]  ;;  %v267_v1 = vld [vmem:[%s227_s23 + $0x10] sm:$0xff]  ;;  %p259_p8 = scmp.lt.s32.totalorder %s746_s15, 1  ;;  %s521_s11 = sshll.u32 %s746_s15, 8 }
  0x40   : > { %528 = vmatprep.subr.mxu0 %v268_v0  ;;  %v263_v2 = vld [vmem:[%s218_s0] sm:$0xff]  ;;  %v266_v3 = vld [vmem:[%s227_s23 + $0x8] sm:$0xff]  ;;  %s257_s18 = scalar_lea.vmem [#allocation7], %s508_s29  ;;  %s920_s8 = scalar_lea.hbm %s975_s3, %s521_s11 }
  0x41   : > { %529 = vmatpush3.msra.mxu0 %v268_v0  ;;  %536 = vmatprep.mubr.msk.f32.mxu0 %vm276_vm0, %v263_v2  ;;  %v265_v4 = vld [vmem:[%s227_s23] sm:$0xff]  ;;  %v264_v5 = vld [vmem:[%s218_s0 + $0x8] sm:$0xff]  ;;  %s260_s24 = scalar_select %p259_p8, %s746_s15, 1 }
  0x42   : > { %530 = vmatprep.subr.mxu0 %v267_v1  ;;  %s378_s19 = sshll.u32 %s257_s18, 4  ;;  %s363_s15 = scalar_lea.sflag [#allocation4], %s891_s28  ;;  %s922_s19 = int_to_ptr.vmem [resolvable:$true] %s378_s19 }
  0x43   : > { %531 = vmatpush3.msra.mxu0 %v267_v1  ;;  %s261_s7 = scalar_lea.vmem %s974_s2, %s260_s24  ;;  %s670_s10 = scalar_lea.vmem %s922_s19, 256 }
  0x44   : > { %532 = vmatprep.subr.mxu0 %v266_v3  ;;  %v511_v6 = vld [vmem:[%s261_s7] ss:$0 sm:$0xff]  ;;  %p671_p0 = scmp.ne.s32.totalorder %s922_s19, %s670_s10  ;;  %s760_s29 = smov [#allocation7]  }
  0x45   : > { %533 = vmatpush3.msra.mxu0 %v266_v3  ;;  %s674_s30 = sshll.u32 %s760_s29, 4  ;;  %s675_s30 = int_to_ptr.vmem [resolvable:$false] %s674_s30 }
  0x46   : > { %534 = vmatprep.subr.mxu0 %v265_v4  ;;  %p672_p2 = pnand %p671_p0, %p834_p9  ;;  %s676_s0 = scalar_lea.vmem %s675_s30, 512 }
  0x47   : > { %535 = vmatpush3.msra.mxu0 %v265_v4  ;;  %p677_p6 = scmp.lt.s32.totalorder %s922_s19, %s675_s30  ;;  %p678_p4 = scmp.lt.s32.totalorder %s676_s0, %s670_s10 }
  0x48   : > { %537 = vmatmul.mubr.msk.f32.vlgmr.msra.gmra.mxu0 %vm276_vm0, %v264_v5  ;;  %p673_p5 = pneg %p672_p2 }
  0x49   : > { %p679_p7 = por %p678_p4, %p677_p6 }
  0x4b   : > { %p680_p1 = pnand %p679_p7, %p673_p5 }
 0x108   : > { %v538_v7 = vpop.f32.mrf.mxu0 }
 0x109   : > { %v355_v8 = vadd.f32 %v538_v7, %v511_v6 }
 0x10a   : > { %v349_v9 = vpop.f32.mrf.mxu0 }
 0x10b   : > { %610 = vtanh.f32 %v355_v8  ;;  %v350_v10 = vadd.f32 %v511_v6, %v349_v9 }
 0x10d   : > { %612 = vtanh.f32 %v350_v10 }
 0x118   : > { %v611_v11 = vpop.eup %610 }
 0x119   : > { %361 = vst.msk [vmem:[%s257_s18 + $0x8] sm:$0xff] %vm276_vm0, %v611_v11 }
 0x11a   : > { %v613_v12 = vpop.eup %612 }
 0x11b   : > { %360 = vst.msk [vmem:[%s257_s18] sm:$0xff] %vm276_vm0, %v613_v12 }
 0x11c   : > { %683 = shalt.err (!%p680_p1)
}
 0x11d   : > { %s684_s9 = scalar_lea.hbm %s920_s8, 256  ;;  %s688_s24 = scalar_lea.hbm %s975_s3, 512 }
 0x11e   : > { %p685_p10 = scmp.ne.s32.totalorder %s920_s8, %s684_s9  ;;  %p689_p8 = scmp.lt.s32.totalorder %s920_s8, %s975_s3 }
 0x11f   : > { %p690_p0 = scmp.lt.s32.totalorder %s688_s24, %s684_s9 }
 0x120   : > { %p686_p13 = pnand %p685_p10, %p834_p9 }
 0x121   : > { %p691_p2 = por %p690_p0, %p689_p8 }
 0x122   : > { %p687_p3 = pneg %p686_p13 }
 0x124   : > { %p692_p5 = pnand %p691_p2, %p687_p3 }
 0x126   : > { %695 = shalt.err (!%p692_p5)
}
 0x127   : > { %s761_s7 = smov 128   ;;  %s762_s11 = smov 8  }
 0x128   : > { %543 = dma.vmem_to_hbm [thread:$0]  (%p834_p9), %s922_s19, 256, %s920_s8, %s363_s15, %s761_s7, %s761_s7, %s762_s11  }
 0x129 PF: > { %s393_s18 = sand.u32 1, %s734_s12   ;;  %p553_p6 = pnand %p500_p12, %p841_p11 }
 0x12a   : > { %s394_s21 = scalar_lea.sflag [#allocation4], %s393_s18 }
 0x12b   : > { %p554_p4 = pneg %p553_p6 }
 0x12d   : > { %729 = dma.done.wait (%p554_p4), %s394_s21, 256  }
 0x12e   : > { %731 = vsyncadd (%p554_p4), %s394_s21, 4294967040  ;;  %s22_s17 = sadd.s32 1, %s754_s17   ;;  %s984_s12 = smov %s738_s13 }
 0x12f   : > { %p19_p7 = scmp.ge.s32.totalorder %s22_s17, 4   ;;  %s985_s13 = smov %s742_s14 }
 0x130   : > { %s986_s14 = smov %s839_s26  ;;  %s987_s15 = smov %s750_s16 }
 0x131   : > { %s988_s16 = smov %s990_s20  ;;  %21 = sbr.rel (!%p19_p7) target bundleno = 10 (0xa), region = 93 }
 0x136   :  { %399 = vsyncpa [#allocation3], 1 }
 0x137   :  { %401 = vsyncpa [#allocation3 + $0x1], 1 }
 0x138   :  { %402 = vsyncpa [#allocation6], 1 }
 0x139   :  { %404 = vsyncpa [#allocation6 + $0x1], 1 }
 0x13a   :  { %405 = vsyncpa [#allocation4], 1 }
 0x13b   :  { %407 = vsyncpa [#allocation4 + $0x1], 1 }

</bundles_post_ra>
